<compile_context>
chip_gen: v5e
topology: v5e:2x2
jax: 0.10.0
libtpu: 0.0.40
codegen_flags: <defaults>
</compile_context>

<pallas_src>
import functools
import math

import jax
import jax.numpy as jnp
from jax.experimental import pallas as pl
from jax.experimental.pallas import tpu as pltpu

_NEG_LARGE = -1e30  # finite "-inf": masked scores underflow to 0 after exp, never NaN


def _pick_tile(dim, candidates, fallback):
    """Largest candidate tile that divides `dim`, else the full dimension."""
    for c in candidates:
        if dim % c == 0:
            return c
    return fallback


# ---------------------------------------------------------------------------
# Kernel 1: tiled bias-free linear  y = x @ W^T   (W stored (out, in), PyTorch-style)
# ---------------------------------------------------------------------------
def _linear_nt_kernel(x_ref, w_ref, o_ref, acc_ref):
    @pl.when(pl.program_id(2) == 0)
    def _():
        acc_ref[...] = jnp.zeros(acc_ref.shape, acc_ref.dtype)

    # Contract x's K axis against W's trailing (in_features) axis: no in-kernel .T,
    # the MXU is fed directly with a transposed-contraction dot_general.
    acc_ref[...] += jax.lax.dot_general(
        x_ref[...], w_ref[...],
        dimension_numbers=(((1,), (1,)), ((), ())),
        preferred_element_type=jnp.float32,
    )

    @pl.when(pl.program_id(2) == pl.num_programs(2) - 1)
    def _():
        o_ref[...] = acc_ref[...].astype(o_ref.dtype)


def linear_nt(x, w):
    """x: (M, K), w: (N, K)  ->  (M, N) == x @ w^T   (tiled, f32 accumulation)."""
    M, K = x.shape
    N, _ = w.shape
    tm = _pick_tile(M, (256, 128, 64, 32, 16, 8), M)   # sublane dim: mult of 8 or full
    tn = _pick_tile(N, (256, 128), N)                  # lane dim of out: 128-mult or full
    tk = _pick_tile(K, (512, 256, 128), K)             # lane dim of x/w: 128-mult or full
    grid = (M // tm, N // tn, K // tk)
    itemsize = jnp.dtype(x.dtype).itemsize
    return pl.pallas_call(
        _linear_nt_kernel,
        out_shape=jax.ShapeDtypeStruct((M, N), x.dtype),
        grid=grid,
        in_specs=[
            pl.BlockSpec((tm, tk), lambda i, j, k: (i, k)),
            pl.BlockSpec((tn, tk), lambda i, j, k: (j, k)),
        ],
        out_specs=pl.BlockSpec((tm, tn), lambda i, j, k: (i, j)),
        scratch_shapes=[pltpu.VMEM((tm, tn), jnp.float32)],
        compiler_params=pltpu.CompilerParams(
            dimension_semantics=("parallel", "parallel", "arbitrary")),
        cost_estimate=pl.CostEstimate(
            flops=2 * M * N * K,
            transcendentals=0,
            bytes_accessed=itemsize * (M * K + N * K + M * N)),
    )(x, w)


# ---------------------------------------------------------------------------
# Kernel 2: flash-attention (online softmax), all heads per grid step.
#   grid = (B, Sq/TQ, Sk/TK), KV axis last and "arbitrary".
# ---------------------------------------------------------------------------
def _flash_mha_kernel(q_ref, k_ref, v_ref, mask_ref, o_ref,
                      m_sc, l_sc, acc_sc, *, num_heads, head_dim):
    kv_step = pl.program_id(2)

    @pl.when(kv_step == 0)
    def _():
        m_sc[...] = jnp.full(m_sc.shape, _NEG_LARGE, m_sc.dtype)
        l_sc[...] = jnp.zeros(l_sc.shape, l_sc.dtype)
        acc_sc[...] = jnp.zeros(acc_sc.shape, acc_sc.dtype)

    scale = 1.0 / math.sqrt(head_dim)
    q = q_ref[...]                      # (TQ, H*hd)
    k = k_ref[...]                      # (TK, H*hd)
    v = v_ref[...]                      # (TK, H*hd)
    keep = mask_ref[...] != 0           # (TQ, TK): DMA'd once per step, shared by heads

    for h in range(num_heads):          # static unroll: all heads in one grid step
        sl = slice(h * head_dim, (h + 1) * head_dim)
        q_h, k_h, v_h = q[:, sl], k[:, sl], v[:, sl]          # (TQ, hd), (TK, hd)

        # scores = q_h @ k_h^T / sqrt(hd)   (transposed-contraction, no .T)
        s = jax.lax.dot_general(
            q_h, k_h, dimension_numbers=(((1,), (1,)), ((), ())),
            preferred_element_type=jnp.float32) * scale       # (TQ, TK)
        s = jnp.where(keep, s, _NEG_LARGE)

        # online softmax update for this head
        m_prev = m_sc[h]                                      # (TQ, 1)
        m_new = jnp.maximum(m_prev, jnp.max(s, axis=-1, keepdims=True))
        alpha = jnp.exp(m_prev - m_new)
        p = jnp.exp(s - m_new)                                # (TQ, TK)
        l_sc[h] = alpha * l_sc[h] + jnp.sum(p, axis=-1, keepdims=True)
        acc_sc[h] = alpha * acc_sc[h] + jax.lax.dot_general(
            p.astype(v_h.dtype), v_h,                         # (TQ, hd) = p @ v_h
            dimension_numbers=(((1,), (0,)), ((), ())),
            preferred_element_type=jnp.float32)
        m_sc[h] = m_new

    @pl.when(kv_step == pl.num_programs(2) - 1)
    def _():
        # Epilogue: multiply by approximate reciprocal (EUP slot) instead of dividing;
        # concatenate heads into one lane-dense (TQ, H*hd) slab and store once.
        outs = [acc_sc[h] * pl.reciprocal(l_sc[h], approx=True)
                for h in range(num_heads)]
        o_ref[...] = jnp.concatenate(outs, axis=-1).astype(o_ref.dtype)


def flash_mha(q, k, v, mask, num_heads):
    """q: (B, Sq, D); k, v: (B, Sk, D); mask: (B, 1, Sq, Sk), nonzero = keep.
    Returns (B, Sq, D)."""
    B, Sq, D = q.shape
    Sk = k.shape[1]
    hd = D // num_heads
    tq = _pick_tile(Sq, (128, 64, 32, 16, 8), Sq)      # conservative for v7x 64MiB VMEM
    tk = _pick_tile(Sk, (512, 256, 128), Sk)
    grid = (B, Sq // tq, Sk // tk)
    itemsize = jnp.dtype(q.dtype).itemsize
    kernel = functools.partial(_flash_mha_kernel, num_heads=num_heads, head_dim=hd)
    return pl.pallas_call(
        kernel,
        out_shape=jax.ShapeDtypeStruct((B, Sq, D), q.dtype),
        grid=grid,
        in_specs=[
            # Q block index is constant across the KV axis -> Pallas skips re-DMA.
            pl.BlockSpec((None, tq, D), lambda b, qi, ki: (b, qi, 0)),
            pl.BlockSpec((None, tk, D), lambda b, qi, ki: (b, ki, 0)),
            pl.BlockSpec((None, tk, D), lambda b, qi, ki: (b, ki, 0)),
            pl.BlockSpec((None, None, tq, tk), lambda b, qi, ki: (b, 0, qi, ki)),
        ],
        out_specs=pl.BlockSpec((None, tq, D), lambda b, qi, ki: (b, qi, 0)),
        scratch_shapes=[
            pltpu.VMEM((num_heads, tq, 1), jnp.float32),   # running max
            pltpu.VMEM((num_heads, tq, 1), jnp.float32),   # running denom
            pltpu.VMEM((num_heads, tq, hd), jnp.float32),  # running numerator (P @ V)
        ],
        compiler_params=pltpu.CompilerParams(
            dimension_semantics=("parallel", "parallel", "arbitrary")),
        cost_estimate=pl.CostEstimate(
            flops=4 * B * num_heads * Sq * Sk * hd,
            transcendentals=B * num_heads * Sq * Sk,
            bytes_accessed=itemsize * (2 * B * Sq * D + 2 * B * Sk * D)
            + mask.size * jnp.dtype(mask.dtype).itemsize),
    )(q, k, v, mask)


# ---------------------------------------------------------------------------
# Full MultiHeadAttentionBlock.forward
# ---------------------------------------------------------------------------
def multihead_attention_forward(queries, keys, values, mask, params, num_heads):
    B, Sq, D = queries.shape
    Sk = keys.shape[1]
    assert D % num_heads == 0, "model_dimension must be divisible by num_heads"
    # TODO(synk): mask=None branch of the PyTorch module (would skip the mask input or
    # generate a causal mask in-kernel with broadcasted_iota).

    # Projections (tiled Pallas matmuls).  Activations stay in (B, S, H*hd) layout;
    # the per-head split happens inside the attention kernel, so no HBM transposes.
    q = linear_nt(queries.reshape(B * Sq, D), params["wq"]).reshape(B, Sq, D)
    k = linear_nt(keys.reshape(B * Sk, D), params["wk"]).reshape(B, Sk, D)
    v = linear_nt(values.reshape(B * Sk, D), params["wv"]).reshape(B, Sk, D)
    # TODO(synk): when queries/keys/values are the same tensor (self-attention), the
    # three projections could be fused into one pallas_call on a concatenated (3D, D)
    # weight; with three distinct input tensors (module API) stacking them would add
    # an extra activation copy, so they are kept as three tiled calls here.

    # Flash attention; output is already the lane-dense (B, Sq, D) slab that the
    # output projection consumes.
    attn = flash_mha(q, k, v, mask, num_heads)

    # Output projection.
    return linear_nt(attn.reshape(B * Sq, D), params["wo"]).reshape(B, Sq, D)


# ---------------------------------------------------------------------------
# Pure-JAX reference for a sanity check
# ---------------------------------------------------------------------------
def reference_forward(queries, keys, values, mask, params, num_heads):
    B, Sq, D = queries.shape
    Sk = keys.shape[1]
    hd = D // num_heads
    q = (queries @ params["wq"].T).reshape(B, Sq, num_heads, hd).transpose(0, 2, 1, 3)
    k = (keys @ params["wk"].T).reshape(B, Sk, num_heads, hd).transpose(0, 2, 1, 3)
    v = (values @ params["wv"].T).reshape(B, Sk, num_heads, hd).transpose(0, 2, 1, 3)
    scores = jnp.einsum("bhqd,bhkd->bhqk", q, k) / math.sqrt(hd)
    scores = jnp.where(mask == 0, -jnp.inf, scores)
    w = jax.nn.softmax(scores, axis=-1)
    o = jnp.einsum("bhqk,bhkd->bhqd", w, v)
    o = o.transpose(0, 2, 1, 3).reshape(B, Sq, D)
    return o @ params["wo"].T


if __name__ == "__main__":
    # Small shapes consistent with the module: model_dimension=32, num_heads=4, head_dim=8
    B, S, D, H = 2, 8, 32, 4

    key = jax.random.PRNGKey(0)
    k_q, k_k, k_v, k_wq, k_wk, k_wv, k_wo = jax.random.split(key, 7)

    queries = jax.random.normal(k_q, (B, S, D), dtype=jnp.float32)
    keys = jax.random.normal(k_k, (B, S, D), dtype=jnp.float32)
    values = jax.random.normal(k_v, (B, S, D), dtype=jnp.float32)

    # Causal mask: (B, 1, S, S), 1 = attend, 0 = masked.
    mask = jnp.tril(jnp.ones((S, S), dtype=jnp.float32))[None, None].repeat(B, axis=0)

    w_scale = 1.0 / math.sqrt(D)
    params = {
        "wq": jax.random.normal(k_wq, (D, D), dtype=jnp.float32) * w_scale,
        "wk": jax.random.normal(k_wk, (D, D), dtype=jnp.float32) * w_scale,
        "wv": jax.random.normal(k_wv, (D, D), dtype=jnp.float32) * w_scale,
        "wo": jax.random.normal(k_wo, (D, D), dtype=jnp.float32) * w_scale,
    }

    out = multihead_attention_forward(queries, keys, values, mask, params, H)
    out = jax.block_until_ready(out)

    ref = reference_forward(queries, keys, values, mask, params, H)
    assert out.shape == (B, S, D)
    # Tolerance covers the approximate-reciprocal softmax epilogue in the kernel.
    assert jnp.allclose(out, ref, atol=2e-2, rtol=2e-2), "mismatch vs reference"

    print("KERNEL_OK")
</pallas_src>

<mosaic_0001>
module attributes {stable_mosaic.version = 11 : i64} {
  func.func @_linear_nt_kernel(%arg0: i32, %arg1: i32, %arg2: i32, %arg3: memref<16x32xf32, #tpu.memory_space<vmem>>, %arg4: memref<32x32xf32, #tpu.memory_space<vmem>>, %arg5: memref<16x32xf32, #tpu.memory_space<vmem>>, %arg6: memref<16x32xf32, #tpu.memory_space<vmem>>) attributes {dimension_semantics = [#tpu.dimension_semantics<parallel>, #tpu.dimension_semantics<parallel>, #tpu.dimension_semantics<arbitrary>], iteration_bounds = array<i64: 1, 1, 1>, scalar_prefetch = 0 : i64, scratch_operands = 1 : i64, tpu.core_type = #tpu.core_type<tc>, window_params = [{transform_indices = @transform_0, window_bounds = array<i64: 16, 32>}, {transform_indices = @transform_1, window_bounds = array<i64: 32, 32>}, {transform_indices = @transform_2, window_bounds = array<i64: 16, 32>}]} {
    %c0_i32 = arith.constant 0 : i32
    %0 = arith.cmpi eq, %arg2, %c0_i32 : i32
    %1 = arith.extui %0 : i1 to i32
    %c0_i32_0 = arith.constant 0 : i32
    %2 = arith.cmpi ne, %1, %c0_i32_0 : i32
    scf.if %2 {
      %cst_10 = arith.constant 0.000000e+00 : f32
      %12 = vector.broadcast %cst_10 : f32 to vector<16x32xf32>
      %c0_11 = arith.constant 0 : index
      %c0_12 = arith.constant 0 : index
      %13 = vector.load %arg6[%c0_11, %c0_12] : memref<16x32xf32, #tpu.memory_space<vmem>>, vector<16x32xf32>
      tpu.vector_store %arg6[%c0_11, %c0_12], %12 {strides = array<i32>} : memref<16x32xf32, #tpu.memory_space<vmem>>, vector<16x32xf32>,
    } else {
    }
    %c0 = arith.constant 0 : index
    %c0_1 = arith.constant 0 : index
    %3 = vector.load %arg6[%c0, %c0_1] : memref<16x32xf32, #tpu.memory_space<vmem>>, vector<16x32xf32>
    %c0_2 = arith.constant 0 : index
    %c0_3 = arith.constant 0 : index
    %4 = vector.load %arg3[%c0_2, %c0_3] : memref<16x32xf32, #tpu.memory_space<vmem>>, vector<16x32xf32>
    %c0_4 = arith.constant 0 : index
    %c0_5 = arith.constant 0 : index
    %5 = vector.load %arg4[%c0_4, %c0_5] : memref<32x32xf32, #tpu.memory_space<vmem>>, vector<32x32xf32>
    %cst = arith.constant dense<0.000000e+00> : vector<16x32xf32>
    %6 = tpu.matmul %4, %5, %cst {dimension_numbers = #tpu.dot_dimension_numbers<[1], [1], [0], [0], [0, 0, 1, 0], [], []>} : vector<16x32xf32>, vector<32x32xf32>, vector<16x32xf32> -> vector<16x32xf32>
    %7 = arith.addf %3, %6 : vector<16x32xf32>
    %c0_6 = arith.constant 0 : index
    %c0_7 = arith.constant 0 : index
    %8 = vector.load %arg6[%c0_6, %c0_7] : memref<16x32xf32, #tpu.memory_space<vmem>>, vector<16x32xf32>
    tpu.vector_store %arg6[%c0_6, %c0_7], %7 {strides = array<i32>} : memref<16x32xf32, #tpu.memory_space<vmem>>, vector<16x32xf32>,
    %c0_i32_8 = arith.constant 0 : i32
    %9 = arith.cmpi eq, %arg2, %c0_i32_8 : i32
    %10 = arith.extui %9 : i1 to i32
    %c0_i32_9 = arith.constant 0 : i32
    %11 = arith.cmpi ne, %10, %c0_i32_9 : i32
    scf.if %11 {
      %c0_10 = arith.constant 0 : index
      %c0_11 = arith.constant 0 : index
      %12 = vector.load %arg6[%c0_10, %c0_11] : memref<16x32xf32, #tpu.memory_space<vmem>>, vector<16x32xf32>
      %c0_12 = arith.constant 0 : index
      %c0_13 = arith.constant 0 : index
      %13 = vector.load %arg5[%c0_12, %c0_13] : memref<16x32xf32, #tpu.memory_space<vmem>>, vector<16x32xf32>
      tpu.vector_store %arg5[%c0_12, %c0_13], %12 {strides = array<i32>} : memref<16x32xf32, #tpu.memory_space<vmem>>, vector<16x32xf32>,
    } else {
    }
    return
  }
  func.func @transform_0(%arg0: i32, %arg1: i32, %arg2: i32) -> (i32, i32) {
    %c0_i32 = arith.constant 0 : i32
    return %arg0, %arg2 : i32, i32
  }
  func.func @transform_1(%arg0: i32, %arg1: i32, %arg2: i32) -> (i32, i32) {
    %c0_i32 = arith.constant 0 : i32
    return %arg1, %arg2 : i32, i32
  }
  func.func @transform_2(%arg0: i32, %arg1: i32, %arg2: i32) -> (i32, i32) {
    %c0_i32 = arith.constant 0 : i32
    return %arg0, %arg1 : i32, i32
  }
}

</mosaic_0001>

<bundles_post_ra>
// kernel: tpu_custom_call.1
= control target key start
LH: loop header
LB: loop body
LE: loop exit
PB: predicated region body
PF: predicated region fallthrough
CT: control target
= control target key end

     0   :  { %7 = vsyncpa [#allocation4], 0  ;;  %s281_s0 = inlined_call_operand.hbm [shape: f32[16,32], index: 0, kind: input, shape index: {}]   ;;  %s282_s1 = inlined_call_operand.hbm [shape: f32[32,32], index: 1, kind: input, shape index: {}]   ;;  %s283_s2 = inlined_call_operand.hbm [shape: f32[16,32], index: 2, kind: output, shape index: {}]  }
   0x1   :  { %8 = vsyncpa [#allocation7], 0 }
   0x2   :  { %9 = vsyncpa [#allocation5], 0  ;;  %s14_s11 = sshll.u32 %s281_s0, 4  ;;  %s226_s12 = smov [#allocation3]   ;;  %s15_s11 = int_to_ptr.hbm [resolvable:$true] %s14_s11 }
   0x3   :  { %s16_s13 = sshll.u32 %s226_s12, 4  ;;  %s27_s16 = sshll.u32 %s282_s1, 4  ;;  %s17_s13 = int_to_ptr.vmem [resolvable:$true] %s16_s13  ;;  %s28_s16 = int_to_ptr.hbm [resolvable:$true] %s27_s16 }
   0x4   :  { %s227_s17 = smov 128   ;;  %s228_s18 = smov 8  }
   0x5   :  { %22 = dma.hbm_to_vmem [thread:$0]  %s15_s11, 256, %s17_s13, [#allocation4], %s227_s17, %s227_s17, %s228_s18  }
   0x6   :  { %s229_s19 = smov [#allocation6]  }
   0x7   :  { %s29_s20 = sshll.u32 %s229_s19, 4  ;;  %s30_s20 = int_to_ptr.vmem [resolvable:$true] %s29_s20 }
   0x8   :  { %35 = dma.hbm_to_vmem [thread:$0]  %s28_s16, 512, %s30_s20, [#allocation7], %s227_s17, %s227_s17, %s228_s18  }
   0x9   :  { %220 = dma.done.wait [#allocation4], 256  }
   0xa   :  { %221 = vsyncadd [#allocation4], 4294967040 }
   0xb   :  { %222 = dma.done.wait [#allocation7], 512  }
   0xc   :  { %223 = vsyncadd [#allocation7], 4294966784  ;;  %vm48_vm0 = vcmask 261120   ;;  %v230_v0 = vmov 0.0   ;;  %v58_v1 = vld [vmem:[#allocation6 + $0x18] sm:$0xff]  ;;  %v57_v2 = vld [vmem:[#allocation6 + $0x10] sm:$0xff] }
   0xd   :  { %49 = vst.msk [vmem:[#allocation2] sm:$0xff] %vm48_vm0, %v230_v0  ;;  %132 = vmatpush.xpose.msk.msra.mxu0 %vm48_vm0, %v58_v1  ;;  %138 = vmatpush.xpose.msk.msra.mxu1 %vm48_vm0, %v58_v1  ;;  %v56_v3 = vld [vmem:[#allocation6 + $0x8] sm:$0xff]  ;;  %v55_v4 = vld [vmem:[#allocation6] sm:$0xff]  ;;  %v53_v5 = vld [vmem:[#allocation3] sm:$0xff]  ;;  %s231_s0 = smov [#allocation8]   ;;  %s118_s23 = sshll.u32 %s283_s2, 4  ;;  %s119_s23 = int_to_ptr.hbm [resolvable:$true] %s118_s23 }
   0xe   :  { %50 = vst.msk [vmem:[#allocation2 + $0x8] sm:$0xff] %vm48_vm0, %v230_v0  ;;  %v54_v6 = vld [vmem:[#allocation3 + $0x8] sm:$0xff]  ;;  %s116_s1 = sshll.u32 %s231_s0, 4  ;;  %s117_s1 = int_to_ptr.vmem [resolvable:$true] %s116_s1 }
  0x11   :  { %133 = vmatpush.xpose.msk.msra.mxu0 %vm48_vm0, %v57_v2  ;;  %139 = vmatpush.xpose.msk.msra.mxu1 %vm48_vm0, %v57_v2 }
  0x14   :  { %v51_v7 = vld [vmem:[#allocation2] sm:$0xff] }
  0x15   :  { %134 = vmatpush.xpose.msk.msra.mxu0 %vm48_vm0, %v56_v3  ;;  %140 = vmatpush.xpose.msk.msra.mxu1 %vm48_vm0, %v56_v3  ;;  %v52_v8 = vld [vmem:[#allocation2 + $0x8] sm:$0xff] }
  0x19   :  { %135 = vmatpush.xpose.msk.msra.mxu0 %vm48_vm0, %v55_v4  ;;  %141 = vmatpush.xpose.msk.msra.mxu1 %vm48_vm0, %v55_v4 }
  0x1c   :  { %136 = vmatmul.msk.f32.vlgmr.msra.gmra.mxu0 %vm48_vm0, %v53_v5  ;;  %137 = vmatmul.msk.f32.vlgmr.msra.gmra.mxu1 %vm48_vm0, %v54_v6 }
  0x99   :  { %v95_v9 = vpop.f32.mrf.mxu0  ;;  %v98_v10 = vpop.f32.mrf.mxu1 }
  0x9a   :  { %v101_v11 = vadd.f32 %v95_v9, %v51_v7  ;;  %v102_v12 = vadd.f32 %v98_v10, %v52_v8 }
  0x9c   :  { %103 = vst.msk [vmem:[#allocation2] sm:$0xff] %vm48_vm0, %v101_v11 }
  0x9d   :  { %104 = vst.msk [vmem:[#allocation2 + $0x8] sm:$0xff] %vm48_vm0, %v102_v12 }
  0xa3   :  { %v108_v13 = vld [vmem:[#allocation2] sm:$0xff] }
  0xa4   :  { %v109_v14 = vld [vmem:[#allocation2 + $0x8] sm:$0xff]  ;;  %110 = vst.msk [vmem:[#allocation8] sm:$0xff] %vm48_vm0, %v108_v13 }
  0xa5   :  { %111 = vst.msk [vmem:[#allocation8 + $0x8] sm:$0xff] %vm48_vm0, %v109_v14 }
  0xa6   :  { %124 = dma.vmem_to_hbm [thread:$0]  %s117_s1, 256, %s119_s23, [#allocation5], %s227_s17, %s227_s17, %s228_s18  }
  0xa7   :  { %224 = dma.done.wait [#allocation5], 256  }
  0xa8   :  { %225 = vsyncadd [#allocation5], 4294967040 }
  0xa9   :  { %129 = vsyncpa [#allocation4], 1 }
  0xaa   :  { %130 = vsyncpa [#allocation7], 1 }
  0xab   :  { %131 = vsyncpa [#allocation5], 1 }

</bundles_post_ra>
